<compile_context>
chip_gen: v7x
topology: tpu7x:2x2x1
jax: 0.10.0
libtpu: 0.0.40
codegen_flags: <defaults>
</compile_context>

<pallas_src>
import jax
import jax.numpy as jnp
from jax.experimental import pallas as pl
from jax.experimental.pallas import tpu as pltpu

N_CLASSES = 10
IN_FEATURES = 128
PAD = 128          # lane-dense width for every hidden / output layer
N_LAYERS = 5
NEG_BIG = -1e30    # finite "-inf" baked into the last-layer bias for padded classes
MAX_BM = 2048      # batch-tile cap (rows)


def _mlp_softmax_kernel(x_ref, w_ref, b_ref, out_ref):
    """Full 5-layer MLP + softmax on one (BM, 128) batch tile.

    x_ref:  (BM, 128)        bf16 activations
    w_ref:  (5, 128, 128)    bf16 zero-padded weights, layout (in_features, out_features)
    b_ref:  (5, 1, 128)      f32 biases; layer-5 padded lanes hold NEG_BIG
    out_ref:(BM, 128)        f32 softmax output (first N_CLASSES lanes valid)
    """
    h = x_ref[...]  # bf16

    # 4 hidden layers with ReLU; f32 accumulate, bf16 feed to the next MXU pass.
    for layer in range(N_LAYERS - 1):
        a = jnp.dot(h, w_ref[layer], preferred_element_type=jnp.float32) + b_ref[layer]
        h = jnp.maximum(a, 0.0).astype(jnp.bfloat16)

    # Final layer: padded class lanes get NEG_BIG directly from the bias
    # (padded weight columns are zero), so no extra masking is needed.
    logits = (jnp.dot(h, w_ref[N_LAYERS - 1], preferred_element_type=jnp.float32)
              + b_ref[N_LAYERS - 1])

    # Softmax over dim=1 (class axis == last axis), numerically stabilized.
    # Exact division so every row sums to 1 to f32 roundoff.
    m = jnp.max(logits, axis=-1, keepdims=True)
    e = jnp.exp(logits - m)
    denom = jnp.sum(e, axis=-1, keepdims=True)
    out_ref[...] = (e / denom).astype(out_ref.dtype)


def _pack_params(params):
    """Zero-pad each (W, b) to (128,128)/(1,128) and stack.

    Returns (w_stack bf16 (5,128,128), b_stack f32 (5,1,128)).  The last layer's
    padded bias lanes are set to NEG_BIG so padded classes vanish under softmax.
    """
    ws, bs = [], []
    for idx, (w, b) in enumerate(params):
        fan_in, fan_out = w.shape
        wp = jnp.zeros((PAD, PAD), jnp.float32).at[:fan_in, :fan_out].set(w)
        fill = NEG_BIG if idx == N_LAYERS - 1 else 0.0
        bp = jnp.full((1, PAD), fill, jnp.float32).at[:, :fan_out].set(b.reshape(1, -1))
        ws.append(wp)
        bs.append(bp)
    return jnp.stack(ws).astype(jnp.bfloat16), jnp.stack(bs)


def _round_up(n, m):
    return -(-n // m) * m


def _choose_bm(batch):
    """One big tile per step: round up to a multiple of 16 (bf16 sublane packing),
    capped at MAX_BM.  Batches > MAX_BM naturally become a multi-step parallel
    grid (useful on v7x's two TensorCores); small batches stay a single step."""
    return min(_round_up(batch, 16), MAX_BM)


def sound_vggish_forward(x, params):
    """x: (batch, 128) float32. params: list of (W, b) with (fan_in, fan_out) layout.
    Returns (batch, N_CLASSES) softmax probabilities (float32)."""
    batch, feat = x.shape
    assert feat == IN_FEATURES, "SoundVGGish expects 128 input features"

    w_stack, b_stack = _pack_params(params)

    bm = _choose_bm(batch)
    padded_batch = _round_up(batch, bm)
    xp = x
    if padded_batch != batch:
        xp = jnp.pad(xp, ((0, padded_batch - batch), (0, 0)))
    xp = xp.astype(jnp.bfloat16)

    grid = (padded_batch // bm,)
    out = pl.pallas_call(
        _mlp_softmax_kernel,
        out_shape=jax.ShapeDtypeStruct((padded_batch, PAD), jnp.float32),
        grid_spec=pltpu.PrefetchScalarGridSpec(
            num_scalar_prefetch=0,
            grid=grid,
            in_specs=[
                pl.BlockSpec((bm, IN_FEATURES), lambda i: (i, 0)),
                pl.BlockSpec((N_LAYERS, PAD, PAD), lambda i: (0, 0, 0)),
                pl.BlockSpec((N_LAYERS, 1, PAD), lambda i: (0, 0, 0)),
            ],
            out_specs=pl.BlockSpec((bm, PAD), lambda i: (i, 0)),
        ),
        compiler_params=pltpu.CompilerParams(
            dimension_semantics=("parallel",)),
    )(xp, w_stack, b_stack)

    return out[:batch, :N_CLASSES]


def init_params(key):
    """Deterministic init matching PyTorch nn.Linear default:
    U(-1/sqrt(fan_in), 1/sqrt(fan_in)) for both W and b. Unpadded shapes."""
    dims = [(128, 100), (100, 80), (80, 50), (50, 25), (25, N_CLASSES)]
    params = []
    for (fan_in, fan_out) in dims:
        key, kw, kb = jax.random.split(key, 3)
        bound = 1.0 / jnp.sqrt(jnp.float32(fan_in))
        w = jax.random.uniform(kw, (fan_in, fan_out), jnp.float32, -bound, bound)
        b = jax.random.uniform(kb, (1, fan_out), jnp.float32, -bound, bound)
        params.append((w, b))
    return params


def reference_forward(x, params):
    """Pure-JAX f32 reference of the PyTorch forward."""
    h = x
    for i, (w, b) in enumerate(params):
        h = h @ w + b
        if i < len(params) - 1:
            h = jnp.maximum(h, 0.0)
    return jax.nn.softmax(h, axis=1)


if __name__ == "__main__":
    key = jax.random.PRNGKey(0)
    key, kx = jax.random.split(key)

    # Small shapes; batch=24 exercises batch padding (24 -> 32) with a single
    # full-batch tile (no artificial grid splitting for small batches).
    batch = 24
    x = jax.random.normal(kx, (batch, IN_FEATURES), jnp.float32)
    params = init_params(key)

    out = jax.block_until_ready(sound_vggish_forward(x, params))
    ref = reference_forward(x, params)

    assert out.shape == (batch, N_CLASSES)
    # bf16 matmul inputs (f32 accumulate) -> loosened element-wise tolerance.
    assert jnp.allclose(out, ref, atol=2e-2, rtol=2e-2), "mismatch vs reference"
    # Exact f32 normalization in-kernel -> rows sum to 1 tightly.
    assert jnp.allclose(jnp.sum(out, axis=1), jnp.ones((batch,)), atol=1e-3)

    print("KERNEL_OK")
</pallas_src>

<mosaic_0001>
module attributes {stable_mosaic.version = 11 : i64} {
  func.func @_mlp_softmax_kernel(%arg0: i32, %arg1: memref<32x128xbf16, #tpu.memory_space<vmem>>, %arg2: memref<5x128x128xbf16, #tpu.memory_space<vmem>>, %arg3: memref<5x1x128xf32, #tpu.memory_space<vmem>>, %arg4: memref<32x128xf32, #tpu.memory_space<vmem>>) attributes {dimension_semantics = [#tpu.dimension_semantics<parallel>], iteration_bounds = array<i64: 1>, scalar_prefetch = 0 : i64, scratch_operands = 0 : i64, tpu.core_type = #tpu.core_type<tc>, window_params = [{transform_indices = @transform_0, window_bounds = array<i64: 32, 128>}, {pipeline_mode = #tpu.pipeline_mode<synchronous>, transform_indices = @transform_1, window_bounds = array<i64: 5, 128, 128>}, {pipeline_mode = #tpu.pipeline_mode<synchronous>, transform_indices = @transform_2, window_bounds = array<i64: 5, 1, 128>}, {transform_indices = @transform_3, window_bounds = array<i64: 32, 128>}]} {
    %c0 = arith.constant 0 : index
    %c0_0 = arith.constant 0 : index
    %0 = vector.load %arg1[%c0, %c0_0] : memref<32x128xbf16, #tpu.memory_space<vmem>>, vector<32x128xbf16>
    %c0_1 = arith.constant 0 : index
    %c0_2 = arith.constant 0 : index
    %c0_3 = arith.constant 0 : index
    %1 = vector.load %arg2[%c0_1, %c0_2, %c0_3] : memref<5x128x128xbf16, #tpu.memory_space<vmem>>, vector<1x128x128xbf16>
    %2 = vector.shape_cast %1 : vector<1x128x128xbf16> to vector<128x128xbf16>
    %cst = arith.constant dense<0.000000e+00> : vector<32x128xf32>
    %3 = tpu.matmul %0, %2, %cst {dimension_numbers = #tpu.dot_dimension_numbers<[1], [0], [0], [1], [0, 0, 1, 1], [], []>} : vector<32x128xbf16>, vector<128x128xbf16>, vector<32x128xf32> -> vector<32x128xf32>
    %c0_4 = arith.constant 0 : index
    %c0_5 = arith.constant 0 : index
    %c0_6 = arith.constant 0 : index
    %4 = vector.load %arg3[%c0_4, %c0_5, %c0_6] : memref<5x1x128xf32, #tpu.memory_space<vmem>>, vector<1x1x128xf32>
    %5 = vector.shape_cast %4 : vector<1x1x128xf32> to vector<1x128xf32>
    %6 = vector.broadcast %5 : vector<1x128xf32> to vector<32x128xf32>
    %7 = arith.addf %3, %6 : vector<32x128xf32>
    %cst_7 = arith.constant 0.000000e+00 : f32
    %8 = vector.broadcast %cst_7 : f32 to vector<32x128xf32>
    %9 = arith.maximumf %7, %8 : vector<32x128xf32>
    %10 = arith.truncf %9 : vector<32x128xf32> to vector<32x128xbf16>
    %c1 = arith.constant 1 : index
    %c0_8 = arith.constant 0 : index
    %c0_9 = arith.constant 0 : index
    %11 = vector.load %arg2[%c1, %c0_8, %c0_9] : memref<5x128x128xbf16, #tpu.memory_space<vmem>>, vector<1x128x128xbf16>
    %12 = vector.shape_cast %11 : vector<1x128x128xbf16> to vector<128x128xbf16>
    %cst_10 = arith.constant dense<0.000000e+00> : vector<32x128xf32>
    %13 = tpu.matmul %10, %12, %cst_10 {dimension_numbers = #tpu.dot_dimension_numbers<[1], [0], [0], [1], [0, 0, 1, 1], [], []>} : vector<32x128xbf16>, vector<128x128xbf16>, vector<32x128xf32> -> vector<32x128xf32>
    %c1_11 = arith.constant 1 : index
    %c0_12 = arith.constant 0 : index
    %c0_13 = arith.constant 0 : index
    %14 = vector.load %arg3[%c1_11, %c0_12, %c0_13] : memref<5x1x128xf32, #tpu.memory_space<vmem>>, vector<1x1x128xf32>
    %15 = vector.shape_cast %14 : vector<1x1x128xf32> to vector<1x128xf32>
    %16 = vector.broadcast %15 : vector<1x128xf32> to vector<32x128xf32>
    %17 = arith.addf %13, %16 : vector<32x128xf32>
    %cst_14 = arith.constant 0.000000e+00 : f32
    %18 = vector.broadcast %cst_14 : f32 to vector<32x128xf32>
    %19 = arith.maximumf %17, %18 : vector<32x128xf32>
    %20 = arith.truncf %19 : vector<32x128xf32> to vector<32x128xbf16>
    %c2 = arith.constant 2 : index
    %c0_15 = arith.constant 0 : index
    %c0_16 = arith.constant 0 : index
    %21 = vector.load %arg2[%c2, %c0_15, %c0_16] : memref<5x128x128xbf16, #tpu.memory_space<vmem>>, vector<1x128x128xbf16>
    %22 = vector.shape_cast %21 : vector<1x128x128xbf16> to vector<128x128xbf16>
    %cst_17 = arith.constant dense<0.000000e+00> : vector<32x128xf32>
    %23 = tpu.matmul %20, %22, %cst_17 {dimension_numbers = #tpu.dot_dimension_numbers<[1], [0], [0], [1], [0, 0, 1, 1], [], []>} : vector<32x128xbf16>, vector<128x128xbf16>, vector<32x128xf32> -> vector<32x128xf32>
    %c2_18 = arith.constant 2 : index
    %c0_19 = arith.constant 0 : index
    %c0_20 = arith.constant 0 : index
    %24 = vector.load %arg3[%c2_18, %c0_19, %c0_20] : memref<5x1x128xf32, #tpu.memory_space<vmem>>, vector<1x1x128xf32>
    %25 = vector.shape_cast %24 : vector<1x1x128xf32> to vector<1x128xf32>
    %26 = vector.broadcast %25 : vector<1x128xf32> to vector<32x128xf32>
    %27 = arith.addf %23, %26 : vector<32x128xf32>
    %cst_21 = arith.constant 0.000000e+00 : f32
    %28 = vector.broadcast %cst_21 : f32 to vector<32x128xf32>
    %29 = arith.maximumf %27, %28 : vector<32x128xf32>
    %30 = arith.truncf %29 : vector<32x128xf32> to vector<32x128xbf16>
    %c3 = arith.constant 3 : index
    %c0_22 = arith.constant 0 : index
    %c0_23 = arith.constant 0 : index
    %31 = vector.load %arg2[%c3, %c0_22, %c0_23] : memref<5x128x128xbf16, #tpu.memory_space<vmem>>, vector<1x128x128xbf16>
    %32 = vector.shape_cast %31 : vector<1x128x128xbf16> to vector<128x128xbf16>
    %cst_24 = arith.constant dense<0.000000e+00> : vector<32x128xf32>
    %33 = tpu.matmul %30, %32, %cst_24 {dimension_numbers = #tpu.dot_dimension_numbers<[1], [0], [0], [1], [0, 0, 1, 1], [], []>} : vector<32x128xbf16>, vector<128x128xbf16>, vector<32x128xf32> -> vector<32x128xf32>
    %c3_25 = arith.constant 3 : index
    %c0_26 = arith.constant 0 : index
    %c0_27 = arith.constant 0 : index
    %34 = vector.load %arg3[%c3_25, %c0_26, %c0_27] : memref<5x1x128xf32, #tpu.memory_space<vmem>>, vector<1x1x128xf32>
    %35 = vector.shape_cast %34 : vector<1x1x128xf32> to vector<1x128xf32>
    %36 = vector.broadcast %35 : vector<1x128xf32> to vector<32x128xf32>
    %37 = arith.addf %33, %36 : vector<32x128xf32>
    %cst_28 = arith.constant 0.000000e+00 : f32
    %38 = vector.broadcast %cst_28 : f32 to vector<32x128xf32>
    %39 = arith.maximumf %37, %38 : vector<32x128xf32>
    %40 = arith.truncf %39 : vector<32x128xf32> to vector<32x128xbf16>
    %c4 = arith.constant 4 : index
    %c0_29 = arith.constant 0 : index
    %c0_30 = arith.constant 0 : index
    %41 = vector.load %arg2[%c4, %c0_29, %c0_30] : memref<5x128x128xbf16, #tpu.memory_space<vmem>>, vector<1x128x128xbf16>
    %42 = vector.shape_cast %41 : vector<1x128x128xbf16> to vector<128x128xbf16>
    %cst_31 = arith.constant dense<0.000000e+00> : vector<32x128xf32>
    %43 = tpu.matmul %40, %42, %cst_31 {dimension_numbers = #tpu.dot_dimension_numbers<[1], [0], [0], [1], [0, 0, 1, 1], [], []>} : vector<32x128xbf16>, vector<128x128xbf16>, vector<32x128xf32> -> vector<32x128xf32>
    %c4_32 = arith.constant 4 : index
    %c0_33 = arith.constant 0 : index
    %c0_34 = arith.constant 0 : index
    %44 = vector.load %arg3[%c4_32, %c0_33, %c0_34] : memref<5x1x128xf32, #tpu.memory_space<vmem>>, vector<1x1x128xf32>
    %45 = vector.shape_cast %44 : vector<1x1x128xf32> to vector<1x128xf32>
    %46 = vector.broadcast %45 : vector<1x128xf32> to vector<32x128xf32>
    %47 = arith.addf %43, %46 : vector<32x128xf32>
    %cst_35 = arith.constant dense<0xFF800000> : vector<32xf32>
    %48 = vector.multi_reduction <maximumf>, %47, %cst_35 [1] : vector<32x128xf32> to vector<32xf32>
    %49 = vector.shape_cast %48 : vector<32xf32> to vector<32x1xf32>
    %50 = vector.broadcast %49 : vector<32x1xf32> to vector<32x128xf32>
    %51 = arith.subf %47, %50 : vector<32x128xf32>
    %52 = math.exp %51 : vector<32x128xf32>
    %cst_36 = arith.constant dense<0.000000e+00> : vector<32xf32>
    %53 = vector.multi_reduction <add>, %52, %cst_36 [1] : vector<32x128xf32> to vector<32xf32>
    %54 = vector.shape_cast %53 : vector<32xf32> to vector<32x1xf32>
    %55 = vector.broadcast %54 : vector<32x1xf32> to vector<32x128xf32>
    %56 = arith.divf %52, %55 : vector<32x128xf32>
    %c0_37 = arith.constant 0 : index
    %c0_38 = arith.constant 0 : index
    %57 = vector.load %arg4[%c0_37, %c0_38] : memref<32x128xf32, #tpu.memory_space<vmem>>, vector<32x128xf32>
    tpu.vector_store %arg4[%c0_37, %c0_38], %56 {strides = array<i32>} : memref<32x128xf32, #tpu.memory_space<vmem>>, vector<32x128xf32>,
    return
  }
  func.func @transform_0(%arg0: i32) -> (i32, i32) {
    %c0_i32 = arith.constant 0 : i32
    %c0_i32_0 = arith.constant 0 : i32
    return %arg0, %c0_i32 : i32, i32
  }
  func.func @transform_1(%arg0: i32) -> (i32, i32, i32) {
    %c0_i32 = arith.constant 0 : i32
    %c0_i32_0 = arith.constant 0 : i32
    %c0_i32_1 = arith.constant 0 : i32
    %c0_i32_2 = arith.constant 0 : i32
    return %c0_i32, %c0_i32_0, %c0_i32_1 : i32, i32, i32
  }
  func.func @transform_2(%arg0: i32) -> (i32, i32, i32) {
    %c0_i32 = arith.constant 0 : i32
    %c0_i32_0 = arith.constant 0 : i32
    %c0_i32_1 = arith.constant 0 : i32
    %c0_i32_2 = arith.constant 0 : i32
    return %c0_i32, %c0_i32_0, %c0_i32_1 : i32, i32, i32
  }
  func.func @transform_3(%arg0: i32) -> (i32, i32) {
    %c0_i32 = arith.constant 0 : i32
    %c0_i32_0 = arith.constant 0 : i32
    return %arg0, %c0_i32 : i32, i32
  }
}

</mosaic_0001>

<bundles_post_ra>
// kernel: tpu_custom_call.1
= control target key start
LH: loop header
LB: loop body
LE: loop exit
PB: predicated region body
PF: predicated region fallthrough
CT: control target
= control target key end

     0   :  { %8 = vsyncpa [#allocation3], 0  ;;  %s1166_s0 = inlined_call_operand.hbm [shape: bf16[32,128], index: 0, kind: input, shape index: {}]   ;;  %s1167_s1 = inlined_call_operand.hbm [shape: bf16[5,128,128], index: 1, kind: input, shape index: {}]   ;;  %s1168_s2 = inlined_call_operand.vmem [shape: f32[5,1,128], index: 2, kind: input, shape index: {}]   ;;  %s1169_s3 = inlined_call_operand.hbm [shape: f32[32,128], index: 3, kind: output, shape index: {}]  }
   0x1   :  { %9 = vsyncpa [#allocation6], 0 }
   0x2   :  { %10 = vsyncpa [#allocation4], 0  ;;  %s1088_s12 = smov [#allocation2]   ;;  %s1016_s16 = scalar_lea.hbm %s1166_s0, 256 }
   0x3   :  { %s16_s13 = sshll.u32 %s1088_s12, 4  ;;  %p1017_p0 = scmp.ne.s32.totalorder %s1166_s0, %s1016_s16  ;;  %s17_s13 = int_to_ptr.vmem [resolvable:$true] %s16_s13 }
   0x4   :  { %p1020_p1 = scmp.lt.u32.totalorder %s1016_s16, %s1166_s0 }
   0x6   :  { %p1022_p2 = pnand %p1020_p1, %p1017_p0 }
   0x8   :  { %1025 = shalt.err (!%p1022_p2)
}
   0x9   :  { %s1026_s21 = scalar_lea.vmem %s17_s13, 256  ;;  %p1031_p4 = scmp.lt.s32.totalorder %s17_s13, %s17_s13 }
   0xa   :  { %p1027_p3 = scmp.ne.s32.totalorder %s17_s13, %s1026_s21  ;;  %p1032_p5 = scmp.lt.s32.totalorder %s1026_s21, %s1026_s21 }
   0xc   :  { %p1033_p6 = por %p1032_p5, %p1031_p4 }
   0xe   :  { %p1034_p7 = pnand %p1033_p6, %p1027_p3 }
  0x10   :  { %1037 = shalt.err (!%p1034_p7)
}
  0x11   :  { %s1089_s22 = smov 64   ;;  %s1090_s23 = smov 4  }
  0x12   :  { %22 = dma.hbm_to_vmem [thread:$0]  %s1166_s0, 256, %s17_s13, [#allocation3], %s1089_s22, %s1089_s22, %s1090_s23  }
  0x13   :  { %s1091_s26 = smov [#allocation5]   ;;  %s1038_s30 = scalar_lea.hbm %s1167_s1, 5120 }
  0x14   :  { %s28_s27 = sshll.u32 %s1091_s26, 4  ;;  %p1039_p8 = scmp.ne.s32.totalorder %s1167_s1, %s1038_s30  ;;  %s29_s27 = int_to_ptr.vmem [resolvable:$true] %s28_s27 }
  0x15   :  { %p1042_p9 = scmp.lt.u32.totalorder %s1038_s30, %s1167_s1 }
  0x17   :  { %p1044_p10 = pnand %p1042_p9, %p1039_p8 }
  0x19   :  { %1047 = shalt.err (!%p1044_p10)
}
  0x1a   :  { %s1048_s8 = scalar_lea.vmem %s29_s27, 5120  ;;  %p1053_p12 = scmp.lt.s32.totalorder %s29_s27, %s29_s27 }
  0x1b   :  { %p1049_p11 = scmp.ne.s32.totalorder %s29_s27, %s1048_s8  ;;  %p1054_p13 = scmp.lt.s32.totalorder %s1048_s8, %s1048_s8 }
  0x1d   :  { %p1055_p0 = por %p1054_p13, %p1053_p12 }
  0x1f   :  { %p1056_p1 = pnand %p1055_p0, %p1049_p11 }
  0x21   :  { %1059 = shalt.err (!%p1056_p1)
}
  0x22   :  { %34 = dma.hbm_to_vmem [thread:$0]  %s1167_s1, 5120, %s29_s27, [#allocation6], %s1089_s22, %s1089_s22, %s1090_s23  }
  0x23   :  { %1082 = dma.done.wait [#allocation3], 256  }
  0x24   :  { %1083 = vsyncadd [#allocation3], 4294967040 }
  0x25   :  { %1084 = dma.done.wait [#allocation6], 5120  }
  0x26   :  { %1085 = vsyncadd [#allocation6], 4294962176  ;;  %v958_v0 = vld [vmem:[#allocation5] sm:$0xff]   ;;  %v959_v1 = vld [vmem:[#allocation5 + $0x8] sm:$0xff]  }
  0x27   :  { %851 = vmatprep.subr.bf16.mxu0 %v958_v0  ;;  %v960_v2 = vld [vmem:[#allocation5 + $0x10] sm:$0xff]   ;;  %v961_v3 = vld [vmem:[#allocation5 + $0x18] sm:$0xff]   ;;  %v968_v5 = vld [vmem:[#allocation5 + $0x40] sm:$0xff]  }
  0x28   :  { %852 = vmatpush3.bf16.msra.mxu0 %v958_v0  ;;  %v966_v4 = vld [vmem:[#allocation2] sm:$0xff]   ;;  %v969_v6 = vld [vmem:[#allocation5 + $0x48] sm:$0xff]   ;;  %v962_v7 = vld [vmem:[#allocation5 + $0x20] sm:$0xff]   ;;  %871 = vmatprep.subr.bf16.mxu1 %v968_v5 }
  0x29   :  { %853 = vmatprep.subr.bf16.mxu0 %v959_v1  ;;  %867 = vmatprep.mubr.bf16.mxu0 %v966_v4  ;;  %v970_v8 = vld [vmem:[#allocation5 + $0x50] sm:$0xff]   ;;  %v963_v9 = vld [vmem:[#allocation5 + $0x28] sm:$0xff]   ;;  %v971_v10 = vld [vmem:[#allocation5 + $0x58] sm:$0xff]  }
  0x2a   :  { %872 = vmatpush3.bf16.msra.mxu1 %v968_v5  ;;  %v964_v11 = vld [vmem:[#allocation5 + $0x30] sm:$0xff]   ;;  %v972_v12 = vld [vmem:[#allocation5 + $0x60] sm:$0xff]   ;;  %v965_v13 = vld [vmem:[#allocation5 + $0x38] sm:$0xff]  }
  0x2b   :  { %873 = vmatprep.subr.bf16.mxu1 %v969_v6  ;;  %v973_v14 = vld [vmem:[#allocation5 + $0x68] sm:$0xff]   ;;  %v967_v15 = vld [vmem:[#allocation2 + $0x8] sm:$0xff]   ;;  %v974_v16 = vld [vmem:[#allocation5 + $0x70] sm:$0xff]  }
  0x2c   :  { %854 = vmatpush3.bf16.msra.mxu0 %v959_v1  ;;  %v975_v17 = vld [vmem:[#allocation5 + $0x78] sm:$0xff]   ;;  %v976_v18 = vld [vmem:[#allocation5 + $0x80] sm:$0xff]   ;;  %v977_v19 = vld [vmem:[#allocation5 + $0x88] sm:$0xff]  }
  0x2d   :  { %855 = vmatprep.subr.bf16.mxu0 %v960_v2  ;;  %v978_v20 = vld [vmem:[#allocation5 + $0x90] sm:$0xff]   ;;  %v979_v21 = vld [vmem:[#allocation5 + $0x98] sm:$0xff]   ;;  %v980_v22 = vld [vmem:[#allocation5 + $0xa0] sm:$0xff]  }
  0x2e   :  { %874 = vmatpush3.bf16.msra.mxu1 %v969_v6  ;;  %v981_v23 = vld [vmem:[#allocation5 + $0xa8] sm:$0xff]   ;;  %v750_v24 = vld [vmem:[%s1168_s2] ss:$0 sm:$0xff]  ;;  %v983_v40 = vld [vmem:[#allocation5 + $0xb8] sm:$0xff]  }
  0x2f   :  { %875 = vmatprep.subr.bf16.mxu1 %v970_v8  ;;  %v982_v39 = vld [vmem:[#allocation5 + $0xb0] sm:$0xff]   ;;  %v984_v41 = vld [vmem:[#allocation5 + $0xc0] sm:$0xff]   ;;  %v985_v42 = vld [vmem:[#allocation5 + $0xc8] sm:$0xff]  }
  0x30   :  { %856 = vmatpush3.bf16.msra.mxu0 %v960_v2  ;;  %v986_v43 = vld [vmem:[#allocation5 + $0xd0] sm:$0xff]   ;;  %v987_v44 = vld [vmem:[#allocation5 + $0xd8] sm:$0xff]   ;;  %v988_v45 = vld [vmem:[#allocation5 + $0xe0] sm:$0xff]  }
  0x31   :  { %857 = vmatprep.subr.bf16.mxu0 %v961_v3  ;;  %v989_v46 = vld [vmem:[#allocation5 + $0xe8] sm:$0xff]   ;;  %v762_v47 = vld [vmem:[%s1168_s2 + $0x1] ss:$0 sm:$0xff]  ;;  %v991_v63 = vld [vmem:[#allocation5 + $0xf8] sm:$0xff]  }
  0x32   :  { %876 = vmatpush3.bf16.msra.mxu1 %v970_v8  ;;  %v990_v62 = vld [vmem:[#allocation5 + $0xf0] sm:$0xff]   ;;  %v992_v0 = vld [vmem:[#allocation5 + $0x100] sm:$0xff]   ;;  %v993_v1 = vld [vmem:[#allocation5 + $0x108] sm:$0xff]  }
  0x33   :  { %877 = vmatprep.subr.bf16.mxu1 %v971_v10  ;;  %v994_v2 = vld [vmem:[#allocation5 + $0x110] sm:$0xff]   ;;  %v996_v4 = vld [vmem:[#allocation5 + $0x120] sm:$0xff]   ;;  %v997_v5 = vld [vmem:[#allocation5 + $0x128] sm:$0xff]  }
  0x34   :  { %858 = vmatpush3.bf16.msra.mxu0 %v961_v3  ;;  %v995_v3 = vld [vmem:[#allocation5 + $0x118] sm:$0xff]   ;;  %v772_v6 = vld [vmem:[%s1168_s2 + $0x2] ss:$0 sm:$0xff] }
  0x35   :  { %859 = vmatprep.subr.bf16.mxu0 %v962_v7 }
  0x36   :  { %878 = vmatpush3.bf16.msra.mxu1 %v971_v10 }
  0x37   :  { %879 = vmatprep.subr.bf16.mxu1 %v972_v12 }
  0x38   :  { %860 = vmatpush3.bf16.msra.mxu0 %v962_v7 }
  0x39   :  { %861 = vmatprep.subr.bf16.mxu0 %v963_v9 }
  0x3a   :  { %880 = vmatpush3.bf16.msra.mxu1 %v972_v12 }
  0x3b   :  { %881 = vmatprep.subr.bf16.mxu1 %v973_v14 }
  0x3c   :  { %862 = vmatpush3.bf16.msra.mxu0 %v963_v9 }
  0x3d   :  { %863 = vmatprep.subr.bf16.mxu0 %v964_v11 }
  0x3e   :  { %882 = vmatpush3.bf16.msra.mxu1 %v973_v14 }
  0x3f   :  { %883 = vmatprep.subr.bf16.mxu1 %v974_v16 }
  0x40   :  { %864 = vmatpush3.bf16.msra.mxu0 %v964_v11 }
  0x41   :  { %865 = vmatprep.subr.bf16.mxu0 %v965_v13 }
  0x42   :  { %884 = vmatpush3.bf16.msra.mxu1 %v974_v16 }
  0x43   :  { %885 = vmatprep.subr.bf16.mxu1 %v975_v17 }
  0x44   :  { %866 = vmatpush3.bf16.msra.mxu0 %v965_v13 }
  0x45   :  { %891 = vmatprep.subr.bf16.mxu0 %v976_v18 }
  0x46   :  { %886 = vmatpush3.bf16.msra.mxu1 %v975_v17 }
  0x47   :  { %868 = vmatmul.mubr.bf16.vlgmr.msra.gmra.mrb[0].mxu0 %v967_v15  ;;  %911 = vmatprep.subr.bf16.mxu1 %v984_v41 }
  0x48   :  { %892 = vmatpush3.bf16.msra.mxu0 %v976_v18 }
  0x49   :  { %893 = vmatprep.subr.bf16.mxu0 %v977_v19 }
  0x4c   :  { %894 = vmatpush3.bf16.msra.mxu0 %v977_v19 }
  0x4d   :  { %895 = vmatprep.subr.bf16.mxu0 %v978_v20 }
  0x50   :  { %896 = vmatpush3.bf16.msra.mxu0 %v978_v20 }
  0x51   :  { %897 = vmatprep.subr.bf16.mxu0 %v979_v21 }
  0x54   :  { %898 = vmatpush3.bf16.msra.mxu0 %v979_v21  ;;  %v998_v21 = vld [vmem:[#allocation5 + $0x130] sm:$0xff]  }
  0x55   :  { %899 = vmatprep.subr.bf16.mxu0 %v980_v22 }
  0x58   :  { %900 = vmatpush3.bf16.msra.mxu0 %v980_v22  ;;  %v999_v22 = vld [vmem:[#allocation5 + $0x138] sm:$0xff]  }
  0x59   :  { %901 = vmatprep.subr.bf16.mxu0 %v981_v23 }
  0x5c   :  { %902 = vmatpush3.bf16.msra.mxu0 %v981_v23  ;;  %v782_v23 = vld [vmem:[%s1168_s2 + $0x3] ss:$0 sm:$0xff] }
  0x5d   :  { %903 = vmatprep.subr.bf16.mxu0 %v982_v39 }
  0x60   :  { %904 = vmatpush3.bf16.msra.mxu0 %v982_v39 }
  0x61   :  { %905 = vmatprep.subr.bf16.mxu0 %v983_v40 }
  0x64   :  { %906 = vmatpush3.bf16.msra.mxu0 %v983_v40 }
  0x65   :  { %931 = vmatprep.subr.bf16.mxu0 %v992_v0 }
 0x11a   :  { %v869_v25 = vpop.f32.mrb[0].mxu0 }
 0x11b   :  { %v174_v26 = vadd.f32 %v869_v25, %v750_v24  ;;  %v165_v27 = vpop.f32.mrb[1].mxu0 }
 0x11c   :  { %v166_v28 = vadd.f32 %v750_v24, %v165_v27  ;;  %v870_v29 = vpop.f32.mrb[2].mxu0 }
 0x11d   :  { %v177_v30 = vadd.f32 %v870_v29, %v750_v24  ;;  %v168_v31 = vpop.f32.mrb[3].mxu0  ;;  %v182_v33 = vmax.f32 %v174_v26, 0.0 }
 0x11e   :  { %v169_v32 = vadd.f32 %v750_v24, %v168_v31  ;;  %v180_v35 = vmax.f32 %v166_v28, 0.0 }
 0x11f   :  { %v183_v34 = vmax.f32 %v177_v30, 0.0 }
 0x120   :  { %v181_v36 = vmax.f32 %v169_v32, 0.0 }
 0x121   :  { %v185_v37 = vpack.c.bf16 %v183_v34, %v182_v33 }
 0x122   :  { %v184_v38 = vpack.c.bf16 %v181_v36, %v180_v35 }
 0x124   :  { %887 = vmatprep.mubr.bf16.mxu1 %v184_v38  ;;  %v792_v38 = vld [vmem:[%s1168_s2 + $0x4] ss:$0 sm:$0xff]  ;;  %s1092_s2 = smov [#allocation7]  }
 0x125   :  { %888 = vmatmul.mubr.bf16.vlgmr.msra.gmra.mrb[0].mxu1 %v185_v37  ;;  %s737_s19 = sshll.u32 %s1092_s2, 4  ;;  %s738_s19 = int_to_ptr.vmem [resolvable:$true] %s737_s19 }
 0x126   :  { %912 = vmatpush3.bf16.msra.mxu1 %v984_v41  ;;  %s1060_s20 = scalar_lea.vmem %s738_s19, 512  ;;  %p1065_p3 = scmp.lt.s32.totalorder %s738_s19, %s738_s19 }
 0x127   :  { %913 = vmatprep.subr.bf16.mxu1 %v985_v42  ;;  %p1061_p2 = scmp.ne.s32.totalorder %s738_s19, %s1060_s20  ;;  %p1066_p4 = scmp.lt.s32.totalorder %s1060_s20, %s1060_s20 }
 0x129   :  { %p1067_p5 = por %p1066_p4, %p1065_p3 }
 0x12a   :  { %914 = vmatpush3.bf16.msra.mxu1 %v985_v42 }
 0x12b   :  { %915 = vmatprep.subr.bf16.mxu1 %v986_v43  ;;  %p1068_p6 = pnand %p1067_p5, %p1061_p2 }
 0x12e   :  { %916 = vmatpush3.bf16.msra.mxu1 %v986_v43 }
 0x12f   :  { %917 = vmatprep.subr.bf16.mxu1 %v987_v44 }
 0x132   :  { %918 = vmatpush3.bf16.msra.mxu1 %v987_v44 }
 0x133   :  { %919 = vmatprep.subr.bf16.mxu1 %v988_v45 }
 0x136   :  { %920 = vmatpush3.bf16.msra.mxu1 %v988_v45 }
 0x137   :  { %921 = vmatprep.subr.bf16.mxu1 %v989_v46 }
 0x13a   :  { %922 = vmatpush3.bf16.msra.mxu1 %v989_v46 }
 0x13b   :  { %923 = vmatprep.subr.bf16.mxu1 %v990_v62 }
 0x13e   :  { %924 = vmatpush3.bf16.msra.mxu1 %v990_v62 }
 0x13f   :  { %925 = vmatprep.subr.bf16.mxu1 %v991_v63 }
 0x142   :  { %926 = vmatpush3.bf16.msra.mxu1 %v991_v63 }
 0x1f8   :  { %v889_v48 = vpop.f32.mrb[0].mxu1 }
 0x1f9   :  { %v302_v49 = vadd.f32 %v889_v48, %v762_v47  ;;  %v293_v50 = vpop.f32.mrb[1].mxu1 }
 0x1fa   :  { %v294_v51 = vadd.f32 %v762_v47, %v293_v50  ;;  %v890_v52 = vpop.f32.mrb[2].mxu1 }
 0x1fb   :  { %v305_v53 = vadd.f32 %v890_v52, %v762_v47  ;;  %v296_v54 = vpop.f32.mrb[3].mxu1  ;;  %v310_v56 = vmax.f32 %v302_v49, 0.0 }
 0x1fc   :  { %v297_v55 = vadd.f32 %v762_v47, %v296_v54  ;;  %v308_v58 = vmax.f32 %v294_v51, 0.0 }
 0x1fd   :  { %v311_v57 = vmax.f32 %v305_v53, 0.0 }
 0x1fe   :  { %v309_v59 = vmax.f32 %v297_v55, 0.0 }
 0x1ff   :  { %v313_v60 = vpack.c.bf16 %v311_v57, %v310_v56 }
 0x200   :  { %v312_v61 = vpack.c.bf16 %v309_v59, %v308_v58 }
 0x202   :  { %907 = vmatprep.mubr.bf16.mxu0 %v312_v61 }
 0x203   :  { %908 = vmatmul.mubr.bf16.vlgmr.msra.gmra.mrb[4].mxu0 %v313_v60 }
 0x204   :  { %932 = vmatpush3.bf16.msra.mxu0 %v992_v0 }
 0x205   :  { %933 = vmatprep.subr.bf16.mxu0 %v993_v1 }
 0x208   :  { %934 = vmatpush3.bf16.msra.mxu0 %v993_v1 }
 0x209   :  { %935 = vmatprep.subr.bf16.mxu0 %v994_v2 }
 0x20c   :  { %936 = vmatpush3.bf16.msra.mxu0 %v994_v2 }
 0x20d   :  { %937 = vmatprep.subr.bf16.mxu0 %v995_v3 }
 0x210   :  { %938 = vmatpush3.bf16.msra.mxu0 %v995_v3 }
 0x211   :  { %939 = vmatprep.subr.bf16.mxu0 %v996_v4 }
 0x214   :  { %940 = vmatpush3.bf16.msra.mxu0 %v996_v4 }
 0x215   :  { %941 = vmatprep.subr.bf16.mxu0 %v997_v5 }
 0x218   :  { %942 = vmatpush3.bf16.msra.mxu0 %v997_v5 }
 0x219   :  { %943 = vmatprep.subr.bf16.mxu0 %v998_v21 }
 0x21c   :  { %944 = vmatpush3.bf16.msra.mxu0 %v998_v21 }
 0x21d   :  { %945 = vmatprep.subr.bf16.mxu0 %v999_v22 }
 0x220   :  { %946 = vmatpush3.bf16.msra.mxu0 %v999_v22 }
 0x2d6   :  { %v909_v7 = vpop.f32.mrb[4].mxu0 }
 0x2d7   :  { %v430_v8 = vadd.f32 %v909_v7, %v772_v6  ;;  %v421_v9 = vpop.f32.mrb[5].mxu0 }
 0x2d8   :  { %v422_v10 = vadd.f32 %v772_v6, %v421_v9  ;;  %v910_v11 = vpop.f32.mrb[6].mxu0 }
 0x2d9   :  { %v433_v12 = vadd.f32 %v910_v11, %v772_v6  ;;  %v424_v13 = vpop.f32.mrb[7].mxu0  ;;  %v438_v15 = vmax.f32 %v430_v8, 0.0 }
 0x2da   :  { %v425_v14 = vadd.f32 %v772_v6, %v424_v13  ;;  %v436_v17 = vmax.f32 %v422_v10, 0.0 }
 0x2db   :  { %v439_v16 = vmax.f32 %v433_v12, 0.0 }
 0x2dc   :  { %v437_v18 = vmax.f32 %v425_v14, 0.0 }
 0x2dd   :  { %v441_v19 = vpack.c.bf16 %v439_v16, %v438_v15 }
 0x2de   :  { %v440_v20 = vpack.c.bf16 %v437_v18, %v436_v17 }
 0x2e0   :  { %927 = vmatprep.mubr.bf16.mxu1 %v440_v20 }
 0x2e1   :  { %928 = vmatmul.mubr.bf16.vlgmr.msra.gmra.mrb[4].mxu1 %v441_v19 }
 0x3b4   :  { %v929_v24 = vpop.f32.mrb[4].mxu1 }
 0x3b5   :  { %v558_v25 = vadd.f32 %v929_v24, %v782_v23  ;;  %v549_v26 = vpop.f32.mrb[5].mxu1 }
 0x3b6   :  { %v550_v27 = vadd.f32 %v782_v23, %v549_v26  ;;  %v930_v28 = vpop.f32.mrb[6].mxu1 }
 0x3b7   :  { %v561_v29 = vadd.f32 %v930_v28, %v782_v23  ;;  %v552_v30 = vpop.f32.mrb[7].mxu1  ;;  %v566_v32 = vmax.f32 %v558_v25, 0.0 }
 0x3b8   :  { %v553_v31 = vadd.f32 %v782_v23, %v552_v30  ;;  %v564_v34 = vmax.f32 %v550_v27, 0.0 }
 0x3b9   :  { %v567_v33 = vmax.f32 %v561_v29, 0.0 }
 0x3ba   :  { %v565_v35 = vmax.f32 %v553_v31, 0.0 }
 0x3bb   :  { %v569_v36 = vpack.c.bf16 %v567_v33, %v566_v32 }
 0x3bc   :  { %v568_v37 = vpack.c.bf16 %v565_v35, %v564_v34 }
 0x3be   :  { %947 = vmatprep.mubr.bf16.mxu0 %v568_v37 }
 0x3bf   :  { %948 = vmatmul.mubr.bf16.vlgmr.msra.gmra.mrb[8].mxu0 %v569_v36 }
 0x492   :  { %v949_v39 = vpop.f32.mrb[8].mxu0 }
 0x493   :  { %v686_v40 = vadd.f32 %v949_v39, %v792_v38  ;;  %v677_v41 = vpop.f32.mrb[9].mxu0 }
 0x494   :  { %v678_v42 = vadd.f32 %v792_v38, %v677_v41  ;;  %v950_v43 = vpop.f32.mrb[10].mxu0 }
 0x495   :  { %696 = vmax.xlane.f32.xlu1 %v686_v40  ;;  %v680_v44 = vpop.f32.mrb[11].mxu0  ;;  %v689_v45 = vadd.f32 %v950_v43, %v792_v38 }
 0x496   :  { %692 = vmax.xlane.f32.xlu0 %v678_v42  ;;  %v681_v46 = vadd.f32 %v792_v38, %v680_v44 }
 0x499   :  { %698 = vmax.xlane.f32.xlu1 %v689_v45 }
 0x49a   :  { %694 = vmax.xlane.f32.xlu0 %v681_v46 }
 0x522   :  { %v697_v47 = vpop.xlane.xlu1 %696 }
 0x523   :  { %v702_v48 = vsub.f32 %v686_v40, %v697_v47  ;;  %v693_v49 = vpop.xlane.xlu0 %692 }
 0x524   :  { %v700_v50 = vsub.f32 %v678_v42, %v693_v49 }
 0x525   :  { %v708_v53 = vmul.f32 1.442695, %v702_v48 }
 0x526   :  { %v704_v51 = vmul.f32 1.442695, %v700_v50  ;;  %v699_v52 = vpop.xlane.xlu1 %698 }
 0x527   :  { %v695_v54 = vpop.xlane.xlu0 %694  ;;  %v703_v55 = vsub.f32 %v689_v45, %v699_v52 }
 0x528   :  { %1000 = vpow2.f32 %v704_v51  ;;  %v701_v56 = vsub.f32 %v681_v46, %v695_v54 }
 0x529   :  { %1002 = vpow2.f32 %v708_v53  ;;  %v710_v58 = vmul.f32 1.442695, %v703_v55 }
 0x52a   :  { %v706_v57 = vmul.f32 1.442695, %v701_v56 }
 0x52c   :  { %1004 = vpow2.f32 %v706_v57 }
 0x52d   :  { %1006 = vpow2.f32 %v710_v58 }
 0x532   :  { %v1001_v59 = vpop.eup %1000 }
 0x533   :  { %712 = vadd.xlane.f32.xlu0 %v1001_v59  ;;  %v1003_v60 = vpop.eup %1002 }
 0x536   :  { %v1005_v61 = vpop.eup %1004 }
 0x537   :  { %716 = vadd.xlane.f32.xlu0 %v1003_v60  ;;  %714 = vadd.xlane.f32.xlu1 %v1005_v61  ;;  %v1007_v62 = vpop.eup %1006 }
 0x53b   :  { %718 = vadd.xlane.f32.xlu1 %v1007_v62 }
 0x5c0   :  { %v713_v63 = vpop.xlane.xlu0 %712 }
 0x5c1   :  { %1008 = vrcp.f32 %v713_v63 }
 0x5c4   :  { %v715_v0 = vpop.xlane.xlu1 %714  ;;  %v717_v1 = vpop.xlane.xlu0 %716 }
 0x5c5   :  { %1010 = vrcp.f32 %v715_v0 }
 0x5c6   :  { %1012 = vrcp.f32 %v717_v1 }
 0x5c8   :  { %v719_v2 = vpop.xlane.xlu1 %718 }
 0x5c9   :  { %1014 = vrcp.f32 %v719_v2 }
 0x5cb   :  { %v1009_v3 = vpop.eup %1008 }
 0x5cc   :  { %v721_v4 = vmul.f32 %v1009_v3, %v1001_v59 }
 0x5ce   :  { %728 = vst [vmem:[#allocation7] sm:$0xff] %v721_v4 }
 0x5cf   :  { %v1011_v5 = vpop.eup %1010 }
 0x5d0   :  { %v1013_v6 = vpop.eup %1012  ;;  %v723_v7 = vmul.f32 %v1011_v5, %v1005_v61 }
 0x5d1   :  { %v725_v8 = vmul.f32 %v1013_v6, %v1003_v60 }
 0x5d2   :  { %729 = vst [vmem:[#allocation7 + $0x8] sm:$0xff] %v723_v7 }
 0x5d3   :  { %v1015_v9 = vpop.eup %1014  ;;  %730 = vst [vmem:[#allocation7 + $0x10] sm:$0xff] %v725_v8 }
 0x5d4   :  { %v727_v10 = vmul.f32 %v1015_v9, %v1007_v62 }
 0x5d6   :  { %731 = vst [vmem:[#allocation7 + $0x18] sm:$0xff] %v727_v10 }
 0x5d7   :  { %1071 = shalt.err (!%p1068_p6)
}
 0x5d8   :  { %s1072_s23 = scalar_lea.hbm %s1169_s3, 512 }
 0x5d9   :  { %p1073_p7 = scmp.ne.s32.totalorder %s1169_s3, %s1072_s23  ;;  %p1076_p8 = scmp.lt.u32.totalorder %s1072_s23, %s1169_s3 }
 0x5db   :  { %p1078_p9 = pnand %p1076_p8, %p1073_p7 }
 0x5dd   :  { %1081 = shalt.err (!%p1078_p9)
}
 0x5de   :  { %s1093_s28 = smov 128   ;;  %s1094_s29 = smov 8  }
 0x5df   :  { %743 = dma.vmem_to_hbm [thread:$0]  %s738_s19, 512, %s1169_s3, [#allocation4], %s1093_s28, %s1093_s28, %s1094_s29  }
 0x5e0   :  { %1086 = dma.done.wait [#allocation4], 512  }
 0x5e1   :  { %1087 = vsyncadd [#allocation4], 4294966784 }
 0x5e2   :  { %747 = vsyncpa [#allocation3], 1 }
 0x5e3   :  { %748 = vsyncpa [#allocation6], 1 }
 0x5e4   :  { %749 = vsyncpa [#allocation4], 1 }

</bundles_post_ra>
